<compile_context>
chip_gen: v7x
topology: tpu7x:2x2x1
jax: 0.10.0
libtpu: 0.0.40
codegen_flags: <defaults>
</compile_context>

<pallas_src>
import math
import functools

import jax
import jax.numpy as jnp
from jax.experimental import pallas as pl
from jax.experimental.pallas import tpu as pltpu


# ----------------------------------------------------------------------------
# Kernels
# ----------------------------------------------------------------------------

def _pe_kernel_2d(x_ref, pe_ref, o_ref, *, scale, batch):
    """Lane-dense path.  x_ref/o_ref: (tS, B*D); pe_ref: (tS, D)."""
    x = x_ref[...].astype(jnp.float32)
    pe = pe_ref[...].astype(jnp.float32)
    if batch > 1:
        # Tile pe along the lane axis so it lines up with the flattened (S, B*D)
        # view of x.  In-VMEM work only -> free under the HBM-bound roofline.
        pe = jnp.concatenate([pe] * batch, axis=-1)
    o_ref[...] = (x * scale + pe).astype(o_ref.dtype)


def _pe_kernel_3d(x_ref, pe_ref, o_ref, *, scale):
    """Dense 3-D path.  x_ref/o_ref: (tS, B, D); pe_ref: (tS, 1, D)."""
    x = x_ref[...].astype(jnp.float32)
    y = x * scale + pe_ref[...].astype(jnp.float32)   # (tS,1,D) broadcasts over B
    o_ref[...] = y.astype(o_ref.dtype)


# ----------------------------------------------------------------------------
# Helpers
# ----------------------------------------------------------------------------

def _round_up(x: int, m: int) -> int:
    return ((x + m - 1) // m) * m


def _sublane_pack(dtype) -> int:
    """Sublane packing multiple: 8 for f32, 16 for bf16, 32 for int8."""
    itemsize = jnp.dtype(dtype).itemsize
    return 8 * max(1, 4 // itemsize)


def _padded_block_bytes(block_shape, itemsize, sublane_pack) -> int:
    """VMEM bytes of one block after sublane/lane padding of the last two dims."""
    shape = list(block_shape)
    shape[-1] = _round_up(shape[-1], 128)
    shape[-2] = _round_up(shape[-2], sublane_pack)
    n = 1
    for s in shape:
        n *= int(s)
    return n * itemsize


def _vmem_limit(pipeline_bytes: int) -> int:
    """Explicit scoped-VMEM limit: pipeline + headroom, >= 32 MiB, <= 64 MiB (v7x)."""
    return int(min(64 << 20, max(32 << 20, pipeline_bytes + (8 << 20))))


def _choose_seq_tile(S: int, row_bytes_padded: int, sublane_mult: int,
                     target_bytes: int):
    """Pick a sequence-tile given a padded-bytes-per-row budget.

    Prefers (a) the whole sequence if it fits, else (b) the largest multiple of
    `sublane_mult` within budget that also divides S (no partial edge block),
    else (c) balanced near-equal tiles.  Returns (tile, divides_S).
    """
    cap = max(1, target_bytes // max(1, row_bytes_padded))
    if cap >= S:
        return S, True
    t_max = max(sublane_mult, (cap // sublane_mult) * sublane_mult)
    t = t_max
    while t >= sublane_mult:
        if S % t == 0:
            if 2 * t >= t_max:          # accept only divisors that keep blocks big
                return t, True
            break
        t -= sublane_mult
    n_blocks = -(-S // t_max)
    t = min(S, _round_up(-(-S // n_blocks), sublane_mult))
    return t, (S % t == 0)


def make_pe_table(max_len: int, d_model: int, dtype=jnp.float32) -> jnp.ndarray:
    """Deterministic sinusoidal table, identical to the PyTorch buffer.

    Returns shape (max_len, 1, d_model) == pe.unsqueeze(0).transpose(0, 1).
    For bf16 activations, build the table in bf16 to halve its HBM read traffic
    (the kernel accumulates in f32 regardless).
    """
    position = jnp.arange(max_len, dtype=jnp.float32)[:, None]              # (L, 1)
    div_term = jnp.exp(
        jnp.arange(0, d_model, 2, dtype=jnp.float32) * (-math.log(10000.0) / d_model)
    )                                                                        # (D/2,)
    pe = jnp.zeros((max_len, d_model), dtype=jnp.float32)
    pe = pe.at[:, 0::2].set(jnp.sin(position * div_term))
    pe = pe.at[:, 1::2].set(jnp.cos(position * div_term))
    return pe[:, None, :].astype(dtype)                                      # (L,1,D)


# ----------------------------------------------------------------------------
# Public entry point
# ----------------------------------------------------------------------------

def positional_encoding(x: jnp.ndarray, pe: jnp.ndarray, d_model: int, *,
                        target_block_bytes: int = 3 << 20,
                        donate_x: bool = False) -> jnp.ndarray:
    """y = x * sqrt(d_model) + pe[:S]   (eval-mode dropout == identity).

    x : (S, B, D), pe : (max_len, 1, D).  Returns (S, B, D) in x.dtype.
    """
    S, B, D = x.shape
    L = pe.shape[0]
    if S > L:
        raise ValueError(f"seq_len {S} exceeds pe table max_len {L}")
    if pe.shape[-1] != D:
        raise ValueError("pe d_model does not match x")

    scale = float(math.sqrt(d_model))
    x_item = jnp.dtype(x.dtype).itemsize
    pe_item = jnp.dtype(pe.dtype).itemsize
    x_pack = _sublane_pack(x.dtype)
    pe_pack = _sublane_pack(pe.dtype)
    io_alias = {0: 0} if donate_x else {}

    dense_3d = (B % x_pack == 0) and (D % 128 == 0)

    if dense_3d:
        # ---- (tS, B, D) blocks: already sublane/lane dense; tS unconstrained ----
        row_bytes = B * D * x_item                       # no padding by construction
        tS, _ = _choose_seq_tile(S, row_bytes, 1, target_block_bytes)
        n_steps = pl.cdiv(S, tS)
        # Pass the full pe table (no HBM copy) whenever the grid cannot step past it.
        pe_use = pe if (n_steps * tS <= L) else pe[:S]

        x_blk = tS * B * D * x_item
        pe_blk = _padded_block_bytes((tS, 1, D), pe_item, pe_pack)
        vmem = _vmem_limit(2 * (2 * x_blk + pe_blk))

        return pl.pallas_call(
            functools.partial(_pe_kernel_3d, scale=scale),
            out_shape=jax.ShapeDtypeStruct((S, B, D), x.dtype),
            grid=(n_steps,),
            in_specs=[
                pl.BlockSpec((tS, B, D), lambda i: (i, 0, 0)),
                pl.BlockSpec((tS, 1, D), lambda i: (i, 0, 0)),
            ],
            out_specs=pl.BlockSpec((tS, B, D), lambda i: (i, 0, 0)),
            input_output_aliases=io_alias,
            compiler_params=pltpu.CompilerParams(
                dimension_semantics=("parallel",),
                vmem_limit_bytes=vmem,
            ),
        )(x, pe_use)

    # ---- lane-dense 2-D path: x viewed as (S, B*D), pe tiled in-kernel ----------
    W = B * D
    x2 = x.reshape(S, W)                    # contiguous memory -> free view
    pe2 = pe.reshape(L, D)

    row_bytes = _round_up(W, 128) * x_item  # padding-aware lane width
    tS, _ = _choose_seq_tile(S, row_bytes, x_pack, target_block_bytes)
    n_steps = pl.cdiv(S, tS)
    pe_use = pe2 if (n_steps * tS <= L) else pe2[:S]

    x_blk = _padded_block_bytes((tS, W), x_item, x_pack)
    pe_blk = _padded_block_bytes((tS, D), pe_item, pe_pack)
    vmem = _vmem_limit(2 * (2 * x_blk + pe_blk))

    out2 = pl.pallas_call(
        functools.partial(_pe_kernel_2d, scale=scale, batch=B),
        out_shape=jax.ShapeDtypeStruct((S, W), x.dtype),
        grid=(n_steps,),
        in_specs=[
            pl.BlockSpec((tS, W), lambda i: (i, 0)),
            pl.BlockSpec((tS, D), lambda i: (i, 0)),
        ],
        out_specs=pl.BlockSpec((tS, W), lambda i: (i, 0)),
        input_output_aliases=io_alias,
        compiler_params=pltpu.CompilerParams(
            dimension_semantics=("parallel",),
            vmem_limit_bytes=vmem,
        ),
    )(x2, pe_use)
    return out2.reshape(S, B, D)


# ----------------------------------------------------------------------------
# Demo / self-test
# ----------------------------------------------------------------------------

if __name__ == "__main__":
    key = jax.random.PRNGKey(0)
    k1, k2 = jax.random.split(key)

    # Case 1: small batch / small d_model -> exercises the lane-dense (S, B*D) path.
    SEQ, BATCH, D_MODEL, MAX_LEN = 8, 2, 32, 64
    x1 = jax.random.normal(k1, (SEQ, BATCH, D_MODEL), dtype=jnp.float32)
    pe1 = make_pe_table(MAX_LEN, D_MODEL)
    out1 = jax.block_until_ready(positional_encoding(x1, pe1, D_MODEL))
    ref1 = x1 * math.sqrt(D_MODEL) + pe1[:SEQ]
    assert out1.shape == x1.shape and out1.dtype == x1.dtype
    assert jnp.allclose(out1, ref1, atol=1e-5, rtol=1e-5), "2-D path mismatch"

    # Case 2: sublane/lane-dense shapes -> exercises the (tS, B, D) path.
    S2, B2, D2, L2 = 16, 8, 128, 32
    x2 = jax.random.normal(k2, (S2, B2, D2), dtype=jnp.float32)
    pe2 = make_pe_table(L2, D2)
    out2 = jax.block_until_ready(positional_encoding(x2, pe2, D2))
    ref2 = x2 * math.sqrt(D2) + pe2[:S2]
    assert out2.shape == x2.shape and out2.dtype == x2.dtype
    assert jnp.allclose(out2, ref2, atol=1e-5, rtol=1e-5), "3-D path mismatch"

    print("KERNEL_OK")
</pallas_src>

<mosaic_0001>
module attributes {stable_mosaic.version = 11 : i64} {
  func.func @_pe_kernel_2d(%arg0: i32, %arg1: memref<8x64xf32, #tpu.memory_space<vmem>>, %arg2: memref<8x32xf32, #tpu.memory_space<vmem>>, %arg3: memref<8x64xf32, #tpu.memory_space<vmem>>) attributes {dimension_semantics = [#tpu.dimension_semantics<parallel>], iteration_bounds = array<i64: 1>, scalar_prefetch = 0 : i64, scratch_operands = 0 : i64, tpu.core_type = #tpu.core_type<tc>, window_params = [{transform_indices = @transform_0, window_bounds = array<i64: 8, 64>}, {transform_indices = @transform_1, window_bounds = array<i64: 8, 32>}, {transform_indices = @transform_2, window_bounds = array<i64: 8, 64>}]} {
    %c0 = arith.constant 0 : index
    %c0_0 = arith.constant 0 : index
    %0 = vector.load %arg1[%c0, %c0_0] : memref<8x64xf32, #tpu.memory_space<vmem>>, vector<8x64xf32>
    %c0_1 = arith.constant 0 : index
    %c0_2 = arith.constant 0 : index
    %1 = vector.load %arg2[%c0_1, %c0_2] : memref<8x32xf32, #tpu.memory_space<vmem>>, vector<8x32xf32>
    %2 = tpu.concatenate %1, %1 in 1 : vector<8x32xf32>, vector<8x32xf32> -> vector<8x64xf32>
    %cst = arith.constant 5.65685415 : f32
    %3 = vector.broadcast %cst : f32 to vector<8x64xf32>
    %4 = arith.mulf %0, %3 : vector<8x64xf32>
    %5 = arith.addf %4, %2 : vector<8x64xf32>
    %c0_3 = arith.constant 0 : index
    %c0_4 = arith.constant 0 : index
    %6 = vector.load %arg3[%c0_3, %c0_4] : memref<8x64xf32, #tpu.memory_space<vmem>>, vector<8x64xf32>
    tpu.vector_store %arg3[%c0_3, %c0_4], %5 {strides = array<i32>} : memref<8x64xf32, #tpu.memory_space<vmem>>, vector<8x64xf32>,
    return
  }
  func.func @transform_0(%arg0: i32) -> (i32, i32) {
    %c0_i32 = arith.constant 0 : i32
    %c0_i32_0 = arith.constant 0 : i32
    return %arg0, %c0_i32 : i32, i32
  }
  func.func @transform_1(%arg0: i32) -> (i32, i32) {
    %c0_i32 = arith.constant 0 : i32
    %c0_i32_0 = arith.constant 0 : i32
    return %arg0, %c0_i32 : i32, i32
  }
  func.func @transform_2(%arg0: i32) -> (i32, i32) {
    %c0_i32 = arith.constant 0 : i32
    %c0_i32_0 = arith.constant 0 : i32
    return %arg0, %c0_i32 : i32, i32
  }
}

</mosaic_0001>

<bundles_post_ra>
// kernel: tpu_custom_call.1
= control target key start
LH: loop header
LB: loop body
LE: loop exit
PB: predicated region body
PF: predicated region fallthrough
CT: control target
= control target key end

     0   :  { %s99_s0 = inlined_call_operand.vmem [shape: f32[8,64], index: 0, kind: input, shape index: {}]   ;;  %s100_s1 = inlined_call_operand.vmem [shape: f32[64,32], index: 1, kind: input, shape index: {}]   ;;  %s101_s2 = inlined_call_operand.hbm [shape: f32[8,64], index: 2, kind: output, shape index: {}]  }
   0x1   :  { %v13_v0 = vld [vmem:[%s100_s1] sm:$0xff] }
   0x2   :  { %7 = vsyncpa [#allocation3], 0  ;;  %s64_s11 = smov 32   ;;  %v12_v1 = vld [vmem:[%s99_s0] sm:$0xff]  ;;  %vm18_vm0 = vcmask 261120   ;;  %s65_s14 = smov [#allocation2]  }
   0x3   :  { %15 = vrot.lane.b32.xlu0 %v13_v0, %s64_s11  ;;  %v20_v2 = vmul.f32 5.656854, %v12_v1  ;;  %s30_s15 = sshll.u32 %s65_s14, 4  ;;  %vm22_vm1 = vcmask 523264   ;;  %s31_s15 = int_to_ptr.vmem [resolvable:$true] %s30_s15 }
   0x4   :  { %s40_s16 = scalar_lea.vmem %s31_s15, 128  ;;  %p45_p1 = scmp.lt.s32.totalorder %s31_s15, %s31_s15 }
   0x5   :  { %p41_p0 = scmp.ne.s32.totalorder %s31_s15, %s40_s16  ;;  %p46_p2 = scmp.lt.s32.totalorder %s40_s16, %s40_s16 }
   0x7   :  { %p47_p3 = por %p46_p2, %p45_p1 }
   0x9   :  { %p48_p4 = pnand %p47_p3, %p41_p0 }
  0x75   :  { %v16_v3 = vpop.permute.xlu0 %15 }
  0x76   :  { %v19_v4 = vsel %vm18_vm0, %v13_v0, %v16_v3 }
  0x77   :  { %v21_v5 = vadd.f32 %v20_v2, %v19_v4 }
  0x79   :  { %23 = vst.msk [vmem:[#allocation2] sm:$0xff] %vm22_vm1, %v21_v5 }
  0x7a   :  { %51 = shalt.err (!%p48_p4)
}
  0x7b   :  { %s52_s0 = scalar_lea.hbm %s101_s2, 128 }
  0x7c   :  { %p53_p5 = scmp.ne.s32.totalorder %s101_s2, %s52_s0  ;;  %p56_p6 = scmp.lt.u32.totalorder %s52_s0, %s101_s2 }
  0x7e   :  { %p58_p7 = pnand %p56_p6, %p53_p5 }
  0x80   :  { %61 = shalt.err (!%p58_p7)
}
  0x81   :  { %33 = dma.vmem_to_hbm [thread:$0]  %s31_s15, 128, %s101_s2, [#allocation3]  }
  0x82   :  { %62 = dma.done.wait [#allocation3], 128  }
  0x83   :  { %63 = vsyncadd [#allocation3], 4294967168 }
  0x84   :  { %37 = vsyncpa [#allocation3], 1 }

</bundles_post_ra>
